<compile_context>
chip_gen: v5e
topology: v5e:2x2
jax: 0.10.0
libtpu: 0.0.40
codegen_flags: <defaults>
</compile_context>

<pallas_src>
import jax
import jax.numpy as jnp
from jax.experimental import pallas as pl
from jax.experimental.pallas import tpu as pltpu


_LANES = 512               # lane-dense last dim (multiple of 128 -> unmasked vst)
_MAX_TILE_ROWS = 2048      # 2048 x 512 f32 = 4 MiB per block buffer
_SMALL_N = 256 * 1024      # below this many elements, fused XLA beats a custom call


def _scale_shift_kernel(x_ref, w_ref, b_ref, o_ref):
    # w_ref / b_ref are (1,) f32 SMEM scalars; x_ref / o_ref are lane-dense
    # (tile_rows, 512) VMEM tiles.  Load native dtype, upcast in-register
    # (free VPU cast), scale-and-shift, cast back to the output dtype.
    x = x_ref[...].astype(jnp.float32)
    o_ref[...] = (x * w_ref[0] + b_ref[0]).astype(o_ref.dtype)


def _pallas_scale_shift(x_slab: jax.Array, w: jax.Array, b: jax.Array) -> jax.Array:
    """x_slab: (rows, 512) lane-dense slab.  Returns x_slab * w + b, same shape/dtype."""
    rows, lanes = x_slab.shape

    if rows <= 8:
        # Single full-array block: (8, 128) divisibility constraint is waived,
        # so no sublane round-up / padded DMA traffic for small inputs.
        tile_rows = rows
    else:
        # Guarantee >= 2 grid steps (so v7x can shard across both TensorCores)
        # and cap each block buffer at _MAX_TILE_ROWS x 512 f32 = 4 MiB.
        # tile_rows is a multiple of 8; a ragged last block is masked by Pallas.
        tile_rows = min(_MAX_TILE_ROWS, ((pl.cdiv(rows, 2) + 7) // 8) * 8)
    grid = pl.cdiv(rows, tile_rows)

    itemsize = jnp.dtype(x_slab.dtype).itemsize

    return pl.pallas_call(
        _scale_shift_kernel,
        out_shape=jax.ShapeDtypeStruct((rows, lanes), x_slab.dtype),
        grid_spec=pl.GridSpec(
            grid=(grid,),
            in_specs=[
                pl.BlockSpec((tile_rows, lanes), lambda i: (i, 0)),
                pl.BlockSpec(memory_space=pltpu.MemorySpace.SMEM),
                pl.BlockSpec(memory_space=pltpu.MemorySpace.SMEM),
            ],
            out_specs=pl.BlockSpec((tile_rows, lanes), lambda i: (i, 0)),
        ),
        compiler_params=pltpu.CompilerParams(
            dimension_semantics=("parallel",),
            vmem_limit_bytes=32 * 1024 * 1024,
        ),
        cost_estimate=pl.CostEstimate(
            flops=2 * rows * lanes,
            transcendentals=0,
            bytes_accessed=2 * rows * lanes * itemsize,
        ),
    )(x_slab, w, b)


def _xla_scale_shift(x_flat: jax.Array, w: jax.Array, b: jax.Array) -> jax.Array:
    # XLA's fused elementwise is already at HBM roofline for this op.
    return (x_flat.astype(jnp.float32) * w[0] + b[0]).astype(x_flat.dtype)


def linear_regression_forward(
    x: jax.Array, weight: jax.Array, bias: jax.Array, *, force_pallas: bool = False
) -> jax.Array:
    """y = x @ weight.T + bias for weight (1, 1), bias (1,).  x: (N, 1) -> (N, 1)."""
    n, f = x.shape
    assert f == 1, "LinearRegressionModel expects in_features == 1"

    w = weight.reshape(-1).astype(jnp.float32)   # (1,) SMEM scalar
    b = bias.reshape(-1).astype(jnp.float32)     # (1,) SMEM scalar
    x_flat = x.reshape(-1)                       # zero-copy

    if (not force_pallas and n < _SMALL_N) or n < _LANES:
        return _xla_scale_shift(x_flat, w, b).reshape(n, 1)

    # Lane-aligned prefix handled by the Pallas kernel; ragged tail by XLA.
    n_main = (n // _LANES) * _LANES
    rows = n_main // _LANES
    x_main_flat = x_flat if n_main == n else x_flat[:n_main]
    x_main = x_main_flat.reshape(rows, _LANES)   # zero-copy reshape of the prefix

    y_main = _pallas_scale_shift(x_main, w, b)

    if n_main == n:
        return y_main.reshape(n, 1)              # zero-copy reshape back

    y_tail = _xla_scale_shift(x_flat[n_main:], w, b)
    return jnp.concatenate([y_main.reshape(-1), y_tail]).reshape(n, 1)


if __name__ == "__main__":
    key = jax.random.PRNGKey(0)
    k1, k2, k3, kw, kb = jax.random.split(key, 5)

    # Parameters matching nn.Linear(1, 1): weight (1, 1), bias (1,)
    weight = jax.random.uniform(kw, (1, 1), jnp.float32, minval=-1.0, maxval=1.0)
    bias = jax.random.uniform(kb, (1,), jnp.float32, minval=-1.0, maxval=1.0)

    def ref(x):
        return x @ weight.T + bias

    # 1) Tiny batch (module-typical shape) -> default dispatch uses fused XLA.
    x_small = jax.random.normal(k1, (8, 1), jnp.float32)
    y_small = jax.block_until_ready(linear_regression_forward(x_small, weight, bias))
    assert y_small.shape == (8, 1)
    assert jnp.allclose(y_small, ref(x_small), atol=1e-6), "small-batch mismatch"

    # 2) Lane-aligned batch -> Pallas kernel, single full-array block (zero copies).
    x_aligned = jax.random.normal(k2, (4096, 1), jnp.float32)
    y_aligned = jax.block_until_ready(
        linear_regression_forward(x_aligned, weight, bias, force_pallas=True))
    assert y_aligned.shape == (4096, 1)
    assert jnp.allclose(y_aligned, ref(x_aligned), atol=1e-6), "aligned kernel mismatch"

    # 3) Non-aligned batch -> Pallas kernel over the aligned prefix (grid=2,
    #    ragged last block) + XLA tail for the final 3 elements.
    x_ragged = jax.random.normal(k3, (13 * 512 + 3, 1), jnp.float32)
    y_ragged = jax.block_until_ready(
        linear_regression_forward(x_ragged, weight, bias, force_pallas=True))
    assert y_ragged.shape == x_ragged.shape
    assert jnp.allclose(y_ragged, ref(x_ragged), atol=1e-6), "ragged kernel mismatch"

    print("KERNEL_OK")
</pallas_src>

<mosaic_0001>
module attributes {stable_mosaic.version = 11 : i64} {
  func.func @_scale_shift_kernel(%arg0: i32, %arg1: memref<8x512xf32, #tpu.memory_space<vmem>>, %arg2: memref<1xf32, #tpu.memory_space<smem>>, %arg3: memref<1xf32, #tpu.memory_space<smem>>, %arg4: memref<8x512xf32, #tpu.memory_space<vmem>>) attributes {dimension_semantics = [#tpu.dimension_semantics<parallel>], iteration_bounds = array<i64: 1>, scalar_prefetch = 0 : i64, scratch_operands = 0 : i64, tpu.core_type = #tpu.core_type<tc>, window_params = [{transform_indices = @transform_0, window_bounds = array<i64: 8, 512>}, {transform_indices = @transform_1, window_bounds = array<i64: 1>}, {transform_indices = @transform_2, window_bounds = array<i64: 1>}, {transform_indices = @transform_3, window_bounds = array<i64: 8, 512>}]} {
    %c0 = arith.constant 0 : index
    %c0_0 = arith.constant 0 : index
    %0 = vector.load %arg1[%c0, %c0_0] : memref<8x512xf32, #tpu.memory_space<vmem>>, vector<8x512xf32>
    %c0_1 = arith.constant 0 : index
    %1 = memref.load %arg2[%c0_1] : memref<1xf32, #tpu.memory_space<smem>>
    %2 = vector.broadcast %1 : f32 to vector<8x512xf32>
    %3 = arith.mulf %0, %2 : vector<8x512xf32>
    %c0_2 = arith.constant 0 : index
    %4 = memref.load %arg3[%c0_2] : memref<1xf32, #tpu.memory_space<smem>>
    %5 = vector.broadcast %4 : f32 to vector<8x512xf32>
    %6 = arith.addf %3, %5 : vector<8x512xf32>
    %c0_3 = arith.constant 0 : index
    %c0_4 = arith.constant 0 : index
    %7 = vector.load %arg4[%c0_3, %c0_4] : memref<8x512xf32, #tpu.memory_space<vmem>>, vector<8x512xf32>
    tpu.vector_store %arg4[%c0_3, %c0_4], %6 {strides = array<i32>} : memref<8x512xf32, #tpu.memory_space<vmem>>, vector<8x512xf32>,
    return
  }
  func.func @transform_0(%arg0: i32) -> (i32, i32) {
    %c0_i32 = arith.constant 0 : i32
    %c0_i32_0 = arith.constant 0 : i32
    return %arg0, %c0_i32 : i32, i32
  }
  func.func @transform_1(%arg0: i32) -> i32 {
    %c0_i32 = arith.constant 0 : i32
    %c0_i32_0 = arith.constant 0 : i32
    return %c0_i32 : i32
  }
  func.func @transform_2(%arg0: i32) -> i32 {
    %c0_i32 = arith.constant 0 : i32
    %c0_i32_0 = arith.constant 0 : i32
    return %c0_i32 : i32
  }
  func.func @transform_3(%arg0: i32) -> (i32, i32) {
    %c0_i32 = arith.constant 0 : i32
    %c0_i32_0 = arith.constant 0 : i32
    return %arg0, %c0_i32 : i32, i32
  }
}

</mosaic_0001>

<bundles_post_ra>
// kernel: tpu_custom_call.1
= control target key start
LH: loop header
LB: loop body
LE: loop exit
PB: predicated region body
PF: predicated region fallthrough
CT: control target
= control target key end

     0   :  { %10 = vsyncpa [#allocation5], 0  ;;  %s156_s0 = inlined_call_operand.hbm [shape: f32[8,512], index: 0, kind: input, shape index: {}]   ;;  %s157_s1 = inlined_call_operand.<no memory space> [shape: f32[1], index: 1, kind: input, shape index: {}]   ;;  %s158_s2 = inlined_call_operand.<no memory space> [shape: f32[1], index: 2, kind: input, shape index: {}]   ;;  %s159_s3 = inlined_call_operand.hbm [shape: f32[8,512], index: 3, kind: output, shape index: {}]  }
   0x1   :  { %11 = vsyncpa [#allocation6], 0  ;;  %s17_s14 = sshll.u32 %s156_s0, 4  ;;  %s122_s15 = smov [#allocation4]   ;;  %s18_s14 = int_to_ptr.hbm [resolvable:$true] %s17_s14 }
   0x2   :  { %s19_s16 = sshll.u32 %s122_s15, 4  ;;  %s20_s16 = int_to_ptr.vmem [resolvable:$true] %s19_s16 }
   0x3   :  { %22 = dma.hbm_to_vmem [thread:$0]  %s18_s14, 512, %s20_s16, [#allocation5]  }
   0x4   :  { %118 = dma.done.wait [#allocation5], 512  }
   0x5   :  { %119 = vsyncadd [#allocation5], 4294966784  ;;  %v36_v0 = vstv %s157_s1  ;;  %v31_v1 = vld [vmem:[#allocation4] sm:$0xff]  ;;  %v42_v2 = vstv %s158_s2  ;;  %v32_v3 = vld [vmem:[#allocation4 + $0x8] sm:$0xff]  ;;  %s123_s0 = smov [#allocation7]   ;;  %s58_s1 = sshll.u32 %s159_s3, 4  ;;  %s59_s1 = int_to_ptr.hbm [resolvable:$true] %s58_s1 }
   0x6   :  { %v33_v4 = vld [vmem:[#allocation4 + $0x10] sm:$0xff]  ;;  %v37_v5 = vmul.f32 %v36_v0, %v31_v1  ;;  %v38_v6 = vmul.f32 %v36_v0, %v32_v3  ;;  %v34_v8 = vld [vmem:[#allocation4 + $0x18] sm:$0xff]  ;;  %s56_s21 = sshll.u32 %s123_s0, 4  ;;  %s57_s21 = int_to_ptr.vmem [resolvable:$true] %s56_s21 }
   0x7   :  { %v39_v7 = vmul.f32 %v36_v0, %v33_v4  ;;  %v40_v9 = vmul.f32 %v36_v0, %v34_v8 }
   0x8   :  { %v43_v10 = vadd.f32 %v42_v2, %v37_v5  ;;  %v44_v11 = vadd.f32 %v42_v2, %v38_v6 }
   0x9   :  { %v45_v12 = vadd.f32 %v42_v2, %v39_v7  ;;  %v46_v13 = vadd.f32 %v42_v2, %v40_v9 }
   0xa   :  { %47 = vst [vmem:[#allocation7] sm:$0xff] %v43_v10 }
   0xb   :  { %48 = vst [vmem:[#allocation7 + $0x8] sm:$0xff] %v44_v11 }
   0xc   :  { %49 = vst [vmem:[#allocation7 + $0x10] sm:$0xff] %v45_v12 }
   0xd   :  { %50 = vst [vmem:[#allocation7 + $0x18] sm:$0xff] %v46_v13 }
   0xe   :  { %61 = dma.vmem_to_hbm [thread:$0]  %s57_s21, 512, %s59_s1, [#allocation6]  }
   0xf   :  { %120 = dma.done.wait [#allocation6], 512  }
  0x10   :  { %121 = vsyncadd [#allocation6], 4294966784 }
  0x11   :  { %66 = vsyncpa [#allocation5], 1 }
  0x12   :  { %67 = vsyncpa [#allocation6], 1 }

</bundles_post_ra>
